<compile_context>
chip_gen: v7x
topology: tpu7x:2x2x1
jax: 0.10.0
libtpu: 0.0.40
codegen_flags: <defaults>
</compile_context>

<pallas_src>
import functools

import jax
import jax.numpy as jnp
from jax import lax
from jax.experimental import pallas as pl
from jax.experimental.pallas import tpu as pltpu


# ---------------------------------------------------------------------------
# Kernel 1: fused QKV projection (one MXU matmul per token tile).
# ---------------------------------------------------------------------------
def _qkv_proj_kernel(x_ref, w_ref, q_ref, k_ref, v_ref, *, scale, d_out):
    # x_ref: (1, tm, d_in); w_ref: (d_in, 3*d_out) = [Wq | Wk | Wv]
    x = x_ref[0]
    qkv = jnp.dot(x, w_ref[...], preferred_element_type=jnp.float32)  # (tm, 3*d_out) f32
    q_ref[0] = (qkv[:, 0:d_out] * scale).astype(q_ref.dtype)   # scale folded into Q
    k_ref[0] = qkv[:, d_out:2 * d_out].astype(k_ref.dtype)
    v_ref[0] = qkv[:, 2 * d_out:3 * d_out].astype(v_ref.dtype)


# ---------------------------------------------------------------------------
# Kernel 2: flash-style causal attention with online softmax.
# ---------------------------------------------------------------------------
def _flash_causal_kernel(q_ref, k_ref, v_ref, o_ref,
                         m_scr, l_scr, acc_scr, *, tq, tk):
    # q_ref: (1, tq, d_out)   k_ref/v_ref: (1, tk, d_out)   o_ref: (1, tq, d_out)
    ki = pl.program_id(2)
    nk = pl.num_programs(2)
    q_start = pl.program_id(1) * tq
    k_start = ki * tk

    @pl.when(ki == 0)
    def _init():
        m_scr[...] = jnp.full_like(m_scr, -jnp.inf)
        l_scr[...] = jnp.zeros_like(l_scr)
        acc_scr[...] = jnp.zeros_like(acc_scr)

    def _step(apply_mask):
        q = q_ref[0]                                             # (tq, d_out) bf16
        k = k_ref[0]                                             # (tk, d_out) bf16
        v = v_ref[0]                                             # (tk, d_out) bf16
        # Q @ K^T without materializing a transpose: contract last dims.
        s = lax.dot_general(q, k, (((1,), (1,)), ((), ())),
                            preferred_element_type=jnp.float32)  # (tq, tk) f32
        if apply_mask:
            # Only diagonal-straddling tiles pay for the mask.
            # global col > global row  <=>  (col_local - row_local) > (q_start - k_start)
            offs = (lax.broadcasted_iota(jnp.int32, (tq, tk), 1)
                    - lax.broadcasted_iota(jnp.int32, (tq, tk), 0))
            s = jnp.where(offs > (q_start - k_start), -jnp.inf, s)

        # Online softmax update.
        m_prev = m_scr[...]
        m_new = jnp.maximum(m_prev, jnp.max(s, axis=-1, keepdims=True))
        alpha = jnp.exp(m_prev - m_new)
        p = jnp.exp(s - m_new)
        l_scr[...] = alpha * l_scr[...] + jnp.sum(p, axis=-1, keepdims=True)
        acc_scr[...] = alpha * acc_scr[...] + jnp.dot(
            p.astype(v.dtype), v, preferred_element_type=jnp.float32)
        m_scr[...] = m_new

    # Tile classification relative to the causal diagonal.
    visible = k_start <= q_start + (tq - 1)            # has at least one col <= row
    fully_visible = (k_start + (tk - 1)) <= q_start    # every col <= every row

    @pl.when(fully_visible)
    def _interior():
        _step(apply_mask=False)

    @pl.when(visible & jnp.logical_not(fully_visible))
    def _diagonal():
        _step(apply_mask=True)

    @pl.when(ki == nk - 1)
    def _finalize():
        inv_l = pl.reciprocal(l_scr[...], approx=True)   # EUP slot, otherwise idle
        o_ref[0] = (acc_scr[...] * inv_l).astype(o_ref.dtype)


# ---------------------------------------------------------------------------
# Tiling helper (dtype-aware).
# ---------------------------------------------------------------------------
def _pick_tile(total, target, multiple):
    """Largest divisor of `total` that is a multiple of `multiple` and <= target."""
    if total <= target:
        return total
    t = (target // multiple) * multiple
    while t >= multiple:
        if total % t == 0:
            return t
        t -= multiple
    # TODO(synk): for awkward T with no small divisor, a pl.cdiv grid with
    # in-kernel row masking would be better than tiny divisor tiles.
    for t in range(min(target, total), 0, -1):
        if total % t == 0:
            return t
    return 1


# ---------------------------------------------------------------------------
# Wrapper.
# ---------------------------------------------------------------------------
def causal_attention(x, wq, wk, wv, *, q_tile=256, kv_tile=256, proj_tile=256,
                     compute_dtype=jnp.bfloat16, vmem_limit_bytes=None):
    """x: (B, T, d_in); wq/wk/wv: (d_in, d_out) (already transposed from nn.Linear).

    Returns (B, T, d_out), matching `CasualAttention.forward` in eval mode.
    """
    B, T, d_in = x.shape
    d_out = wq.shape[1]
    scale = 1.0 / (d_out ** 0.5)

    cdt = jnp.dtype(compute_dtype) if compute_dtype is not None else x.dtype
    sub = max(8, 32 // jnp.dtype(cdt).itemsize)     # sublane packing: f32->8, bf16->16
    tm = _pick_tile(T, proj_tile, sub)
    tq = _pick_tile(T, q_tile, sub)
    tk = _pick_tile(T, kv_tile, sub)
    nq, nk = T // tq, T // tk
    # Note (v7x): with 2 TCs per chip, B*nq should be >= 2 so the "parallel" axes
    # actually feed both cores; pick a smaller q_tile if B == 1.

    # Fused [Wq | Wk | Wv] slab in the compute dtype (bf16 halves its footprint).
    wqkv = jnp.concatenate([wq, wk, wv], axis=1).astype(cdt)
    x_c = x.astype(cdt)

    cparams2 = pltpu.CompilerParams(
        dimension_semantics=("parallel", "parallel"),
        vmem_limit_bytes=vmem_limit_bytes,
    )
    cparams3 = pltpu.CompilerParams(
        dimension_semantics=("parallel", "parallel", "arbitrary"),
        vmem_limit_bytes=vmem_limit_bytes,
    )

    # --- Pass 1: project Q (scaled), K, V once. ---
    q, k, v = pl.pallas_call(
        functools.partial(_qkv_proj_kernel, scale=scale, d_out=d_out),
        out_shape=(
            jax.ShapeDtypeStruct((B, T, d_out), cdt),
            jax.ShapeDtypeStruct((B, T, d_out), cdt),
            jax.ShapeDtypeStruct((B, T, d_out), cdt),
        ),
        grid_spec=pltpu.PrefetchScalarGridSpec(
            num_scalar_prefetch=0,
            grid=(B, T // tm),
            in_specs=[
                pl.BlockSpec((1, tm, d_in), lambda b, i: (b, i, 0)),
                pl.BlockSpec((d_in, 3 * d_out), lambda b, i: (0, 0)),   # constant: fetched once
            ],
            out_specs=[
                pl.BlockSpec((1, tm, d_out), lambda b, i: (b, i, 0)),
                pl.BlockSpec((1, tm, d_out), lambda b, i: (b, i, 0)),
                pl.BlockSpec((1, tm, d_out), lambda b, i: (b, i, 0)),
            ],
        ),
        compiler_params=cparams2,
    )(x_c, wqkv)

    # Clamp the KV block index so above-diagonal (skipped) steps re-use the
    # previous block instead of DMA-ing data the kernel never reads.
    def _kv_map(b, qi, ki):
        return (b, jnp.minimum(ki, (qi * tq + tq - 1) // tk), 0)

    # --- Pass 2: flash attention with causal mask and online softmax. ---
    out = pl.pallas_call(
        functools.partial(_flash_causal_kernel, tq=tq, tk=tk),
        out_shape=jax.ShapeDtypeStruct((B, T, d_out), x.dtype),
        grid_spec=pltpu.PrefetchScalarGridSpec(
            num_scalar_prefetch=0,
            grid=(B, nq, nk),
            in_specs=[
                pl.BlockSpec((1, tq, d_out), lambda b, qi, ki: (b, qi, 0)),  # Q resident over ki
                pl.BlockSpec((1, tk, d_out), _kv_map),                       # K
                pl.BlockSpec((1, tk, d_out), _kv_map),                       # V
            ],
            out_specs=pl.BlockSpec((1, tq, d_out), lambda b, qi, ki: (b, qi, 0)),
            scratch_shapes=[
                pltpu.VMEM((tq, 1), jnp.float32),      # running max m
                pltpu.VMEM((tq, 1), jnp.float32),      # running sum l
                pltpu.VMEM((tq, d_out), jnp.float32),  # output accumulator
            ],
        ),
        compiler_params=cparams3,
    )(q, k, v)
    return out


def reference_attention(x, wq, wk, wv):
    """Plain-JAX reference mirroring the PyTorch forward (dropout = identity)."""
    d_out = wq.shape[1]
    q = x @ wq
    k = x @ wk
    v = x @ wv
    s = jnp.einsum("btd,bsd->bts", q, k)
    T = x.shape[1]
    mask = jnp.triu(jnp.ones((T, T), dtype=bool), k=1)
    s = jnp.where(mask[None], -jnp.inf, s)
    w = jax.nn.softmax(s / (d_out ** 0.5), axis=-1)
    return w @ v


if __name__ == "__main__":
    # Small, deterministic setup consistent with the module's forward:
    # batch=2, seq (num_tokens)=8, d_in=32, d_out=32, context_length=8, dropout=0.0
    B, T, d_in, d_out = 2, 8, 32, 32

    key = jax.random.PRNGKey(0)
    kx, kq, kk, kv = jax.random.split(key, 4)

    x = jax.random.normal(kx, (B, T, d_in), dtype=jnp.float32)

    # nn.Linear weights are (d_out, d_in); transpose to (d_in, d_out) for y = x @ W.T.
    wq_pt = jax.random.normal(kq, (d_out, d_in), dtype=jnp.float32) * 0.1
    wk_pt = jax.random.normal(kk, (d_out, d_in), dtype=jnp.float32) * 0.1
    wv_pt = jax.random.normal(kv, (d_out, d_in), dtype=jnp.float32) * 0.1
    wq, wk, wv = wq_pt.T, wk_pt.T, wv_pt.T

    out = causal_attention(x, wq, wk, wv)
    out = jax.block_until_ready(out)

    ref = reference_attention(x, wq, wk, wv)
    assert out.shape == (B, T, d_out)
    # Tolerance covers bf16 Q/K/V/P operands and the approx EUP reciprocal.
    assert jnp.allclose(out, ref, atol=2e-2, rtol=2e-2), "mismatch vs reference"

    print("KERNEL_OK")
</pallas_src>

<mosaic_0001>
module attributes {stable_mosaic.version = 11 : i64} {
  func.func @_qkv_proj_kernel(%arg0: i32, %arg1: i32, %arg2: memref<1x8x32xbf16, #tpu.memory_space<vmem>>, %arg3: memref<32x96xbf16, #tpu.memory_space<vmem>>, %arg4: memref<1x8x32xbf16, #tpu.memory_space<vmem>>, %arg5: memref<1x8x32xbf16, #tpu.memory_space<vmem>>, %arg6: memref<1x8x32xbf16, #tpu.memory_space<vmem>>) attributes {dimension_semantics = [#tpu.dimension_semantics<parallel>, #tpu.dimension_semantics<parallel>], iteration_bounds = array<i64: 2, 1>, scalar_prefetch = 0 : i64, scratch_operands = 0 : i64, tpu.core_type = #tpu.core_type<tc>, window_params = [{transform_indices = @transform_0, window_bounds = array<i64: 1, 8, 32>}, {pipeline_mode = #tpu.pipeline_mode<synchronous>, transform_indices = @transform_1, window_bounds = array<i64: 32, 96>}, {transform_indices = @transform_2, window_bounds = array<i64: 1, 8, 32>}, {transform_indices = @transform_3, window_bounds = array<i64: 1, 8, 32>}, {transform_indices = @transform_4, window_bounds = array<i64: 1, 8, 32>}]} {
    %c0 = arith.constant 0 : index
    %c0_0 = arith.constant 0 : index
    %c0_1 = arith.constant 0 : index
    %0 = vector.load %arg2[%c0, %c0_0, %c0_1] : memref<1x8x32xbf16, #tpu.memory_space<vmem>>, vector<1x8x32xbf16>
    %1 = vector.shape_cast %0 : vector<1x8x32xbf16> to vector<8x32xbf16>
    %c0_2 = arith.constant 0 : index
    %c0_3 = arith.constant 0 : index
    %2 = vector.load %arg3[%c0_2, %c0_3] : memref<32x96xbf16, #tpu.memory_space<vmem>>, vector<32x96xbf16>
    %cst = arith.constant dense<0.000000e+00> : vector<8x96xf32>
    %3 = tpu.matmul %1, %2, %cst {dimension_numbers = #tpu.dot_dimension_numbers<[1], [0], [0], [1], [0, 0, 1, 1], [], []>} : vector<8x32xbf16>, vector<32x96xbf16>, vector<8x96xf32> -> vector<8x96xf32>
    %4 = vector.extract_strided_slice %3 {offsets = [0, 0], sizes = [8, 32], strides = [1, 1]} : vector<8x96xf32> to vector<8x32xf32>
    %cst_4 = arith.constant 0.176776692 : f32
    %5 = vector.broadcast %cst_4 : f32 to vector<8x32xf32>
    %6 = arith.mulf %4, %5 : vector<8x32xf32>
    %7 = arith.truncf %6 : vector<8x32xf32> to vector<8x32xbf16>
    %c0_5 = arith.constant 0 : index
    %c0_6 = arith.constant 0 : index
    %c0_7 = arith.constant 0 : index
    %8 = vector.load %arg4[%c0_5, %c0_6, %c0_7] : memref<1x8x32xbf16, #tpu.memory_space<vmem>>, vector<1x8x32xbf16>
    %9 = vector.shape_cast %8 : vector<1x8x32xbf16> to vector<8x32xbf16>
    %10 = vector.shape_cast %7 : vector<8x32xbf16> to vector<1x8x32xbf16>
    tpu.vector_store %arg4[%c0_5, %c0_6, %c0_7], %10 {strides = array<i32>} : memref<1x8x32xbf16, #tpu.memory_space<vmem>>, vector<1x8x32xbf16>,
    %11 = vector.extract_strided_slice %3 {offsets = [0, 32], sizes = [8, 32], strides = [1, 1]} : vector<8x96xf32> to vector<8x32xf32>
    %12 = arith.truncf %11 : vector<8x32xf32> to vector<8x32xbf16>
    %c0_8 = arith.constant 0 : index
    %c0_9 = arith.constant 0 : index
    %c0_10 = arith.constant 0 : index
    %13 = vector.load %arg5[%c0_8, %c0_9, %c0_10] : memref<1x8x32xbf16, #tpu.memory_space<vmem>>, vector<1x8x32xbf16>
    %14 = vector.shape_cast %13 : vector<1x8x32xbf16> to vector<8x32xbf16>
    %15 = vector.shape_cast %12 : vector<8x32xbf16> to vector<1x8x32xbf16>
    tpu.vector_store %arg5[%c0_8, %c0_9, %c0_10], %15 {strides = array<i32>} : memref<1x8x32xbf16, #tpu.memory_space<vmem>>, vector<1x8x32xbf16>,
    %16 = vector.extract_strided_slice %3 {offsets = [0, 64], sizes = [8, 32], strides = [1, 1]} : vector<8x96xf32> to vector<8x32xf32>
    %17 = arith.truncf %16 : vector<8x32xf32> to vector<8x32xbf16>
    %c0_11 = arith.constant 0 : index
    %c0_12 = arith.constant 0 : index
    %c0_13 = arith.constant 0 : index
    %18 = vector.load %arg6[%c0_11, %c0_12, %c0_13] : memref<1x8x32xbf16, #tpu.memory_space<vmem>>, vector<1x8x32xbf16>
    %19 = vector.shape_cast %18 : vector<1x8x32xbf16> to vector<8x32xbf16>
    %20 = vector.shape_cast %17 : vector<8x32xbf16> to vector<1x8x32xbf16>
    tpu.vector_store %arg6[%c0_11, %c0_12, %c0_13], %20 {strides = array<i32>} : memref<1x8x32xbf16, #tpu.memory_space<vmem>>, vector<1x8x32xbf16>,
    return
  }
  func.func @transform_0(%arg0: i32, %arg1: i32) -> (i32, i32, i32) {
    %c0_i32 = arith.constant 0 : i32
    %c0_i32_0 = arith.constant 0 : i32
    return %arg0, %arg1, %c0_i32 : i32, i32, i32
  }
  func.func @transform_1(%arg0: i32, %arg1: i32) -> (i32, i32) {
    %c0_i32 = arith.constant 0 : i32
    %c0_i32_0 = arith.constant 0 : i32
    %c0_i32_1 = arith.constant 0 : i32
    return %c0_i32, %c0_i32_0 : i32, i32
  }
  func.func @transform_2(%arg0: i32, %arg1: i32) -> (i32, i32, i32) {
    %c0_i32 = arith.constant 0 : i32
    %c0_i32_0 = arith.constant 0 : i32
    return %arg0, %arg1, %c0_i32 : i32, i32, i32
  }
  func.func @transform_3(%arg0: i32, %arg1: i32) -> (i32, i32, i32) {
    %c0_i32 = arith.constant 0 : i32
    %c0_i32_0 = arith.constant 0 : i32
    return %arg0, %arg1, %c0_i32 : i32, i32, i32
  }
  func.func @transform_4(%arg0: i32, %arg1: i32) -> (i32, i32, i32) {
    %c0_i32 = arith.constant 0 : i32
    %c0_i32_0 = arith.constant 0 : i32
    return %arg0, %arg1, %c0_i32 : i32, i32, i32
  }
}

</mosaic_0001>

<bundles_post_ra>
// kernel: tpu_custom_call.1
= control target key start
LH: loop header
LB: loop body
LE: loop exit
PB: predicated region body
PF: predicated region fallthrough
CT: control target
= control target key end

     0   :  { %10 = vsyncpa [#allocation3], 0  ;;  %s1217_s0 = inlined_call_operand.hbm [shape: bf16[2,8,32], index: 0, kind: input, shape index: {}]   ;;  %s1218_s1 = inlined_call_operand.hbm [shape: bf16[32,96], index: 1, kind: input, shape index: {}]   ;;  %s1219_s2 = inlined_call_operand.hbm [shape: bf16[2,8,32], index: 2, kind: output, shape index: {0}]   ;;  %s1220_s3 = inlined_call_operand.hbm [shape: bf16[2,8,32], index: 3, kind: output, shape index: {1}]   ;;  %s1221_s4 = inlined_call_operand.hbm [shape: bf16[2,8,32], index: 4, kind: output, shape index: {2}]  }
   0x1   :  { %12 = vsyncpa [#allocation3 + $0x1], 0 }
   0x2   :  { %13 = vsyncpa [#allocation6], 0 }
   0x3   :  { %14 = vsyncpa [#allocation4], 0 }
   0x4   :  { %16 = vsyncpa [#allocation4 + $0x1], 0 }
   0x5   :  { %17 = vsyncpa [#allocation9], 0 }
   0x6   :  { %19 = vsyncpa [#allocation9 + $0x1], 0  ;;  %s921_s15 = smov 0   ;;  %s923_s16 = smov 0  }
   0x7   :  { %s925_s17 = smov 0   ;;  %s927_s18 = smov 0  }
   0x8   :  { %s929_s19 = smov 0   ;;  %s931_s20 = smov 0  }
   0x9 LB: > { %s952_s21 = sadd.s32 4294967295, %s883_s20   ;;  %s552_s22 = sadd.s32 4294967294, %s883_s20   ;;  %s883_s20 = sphi %s931_s20, %s25_s20   ;;  %s879_s19 = sphi %s929_s19, %s1243_s19   ;;  %s875_s18 = sphi %s927_s18, %s1242_s18   ;;  %s871_s17 = sphi %s925_s17, %s1241_s17   ;;  %s867_s16 = sphi %s923_s16, %s1240_s16   ;;  %s863_s15 = sphi %s921_s15, %s1239_s15  }
   0xa   : > { %p59_p0 = scmp.ne.s32.totalorder %s867_s16, %s863_s15  ;;  %p1222_p1 = scmp.eq.s32.totalorder %s952_s21, 0 }
   0xb   : > { %p112_p3 = scmp.eq.s32.totalorder %s552_s22, 1  ;;  %p553_p5 = scmp.ge.s32.totalorder %s883_s20, 1 }
   0xc   : > { %p963_p4 = por %p1222_p1, %p59_p0  ;;  %p175_p7 = scmp.lt.s32.totalorder %s883_s20, 3 }
   0xd   : > { %p968_p6 = por %p112_p3, %p59_p0  ;;  %s885_s26 = smov [#allocation5]  }
   0xe   : > { %s1225_s23 = scalar_select %p963_p4, 1, 0 }
   0xf   : > { %s1226_s24 = scalar_select %p968_p6, 1, 0 }
  0x10   : > { %p973_p8 = pnand %p553_p5, %p175_p7  ;;  %s187_s27 = sshll.u32 %s885_s26, 4  ;;  %s188_s27 = int_to_ptr.vmem [resolvable:$true] %s187_s27 }
  0x11   : > { %s37_s29 = sadd.s32 1, %s879_s19  ;;  %s679_s6 = scalar_lea.hbm %s1218_s1, 256 }
  0x12   : > { %s1227_s25 = scalar_select %p973_p8, 1, 0 }
  0x13   : > { %p600_p9 = pneg %p973_p8  ;;  %p680_p12 = scmp.ne.s32.totalorder %s1218_s1, %s679_s6 }
  0x14   : > { %p686_p5 = scmp.lt.u32.totalorder %s679_s6, %s1218_s1 }
  0x15   : > { %p982_p11 = pnand %p600_p9, %p1222_p1 }
  0x17   : > { %p681_p13 = pneg %p982_p11 }
  0x19   : > { %p682_p0 = pnand %p681_p13, %p680_p12 }
  0x1b   : > { %p683_p3 = pneg %p682_p0 }
  0x1d   : > { %p688_p7 = pnand %p686_p5, %p683_p3 }
  0x1f   : > { %691 = shalt.err (!%p688_p7)
}
  0x20   : > { %s692_s11 = scalar_lea.vmem %s188_s27, 256  ;;  %p700_p2 = scmp.lt.s32.totalorder %s188_s27, %s188_s27 }
  0x21   : > { %p693_p9 = scmp.ne.s32.totalorder %s188_s27, %s692_s11  ;;  %p701_p6 = scmp.lt.s32.totalorder %s692_s11, %s692_s11 }
  0x23   : > { %p695_p10 = pnand %p693_p9, %p681_p13  ;;  %p702_p4 = por %p701_p6, %p700_p2 }
  0x25   : > { %p696_p1 = pneg %p695_p10 }
  0x27   : > { %p703_p8 = pnand %p702_p4, %p696_p1 }
  0x29   : > { %706 = shalt.err (!%p703_p8)
}
  0x2a   : > { %s886_s12 = smov 64   ;;  %s887_s13 = smov 4  }
  0x2b   : > { %603 = dma.hbm_to_vmem [thread:$0]  (!%p982_p11), %s1218_s1, 256, %s188_s27, [#allocation6], %s886_s12, %s886_s12, %s887_s13  }
  0x2c   : > { %p39_p1 = scmp.ge.s32.totalorder %s37_s29, 2  ;;  %s46_s30 = sadd.s32 1, %s871_s17 }
  0x2d   : > { %p53_p2 = scmp.ne.s32.totalorder %s871_s17, %s867_s16  ;;  %p54_p4 = scmp.eq.s32.totalorder %s883_s20, 0 }
  0x2e   : > { %s1245_s29 = smov (%p39_p1, %s37_s29), 0  ;;  %p1230_p8 = scmp.eq.s32.totalorder %s952_s21, 1 }
  0x2f   : > { %p1009_p6 = por %p54_p4, %p53_p2  ;;  %s41_s28 = ssub.s32 %s879_s19, %s1245_s29 }
  0x30   : > { %p1015_p10 = por %p1230_p8, %p53_p2  ;;  %p619_p12 = scmp.lt.s32.totalorder %s883_s20, 2 }
  0x31   : > { %p44_p11 = scmp.eq.s32.totalorder %s41_s28, 0  ;;  %s201_s27 = sand.u32 1, %s871_s17  }
  0x32   : > { %s556_s7 = sshll.u32 %s201_s27, 2  ;;  %s557_s9 = sshll.u32 %s879_s19, 6 }
  0x33   : > { %s1024_s8 = scalar_select %p44_p11, %s871_s17, %s46_s30  }
  0x34   : > { %s1030_s12 = scalar_lea.hbm %s1217_s0, %s557_s9  ;;  %s205_s13 = scalar_lea.vmem [#allocation2], %s556_s7 }
  0x35   : > { %s213_s14 = sshll.u32 %s205_s13, 4  ;;  %p1036_p13 = pnand %p619_p12, %p1009_p6  ;;  %s1032_s14 = int_to_ptr.vmem [resolvable:$true] %s213_s14 }
  0x36   : > { %s202_s30 = scalar_lea.sflag [#allocation3], %s201_s27  ;;  %s707_s28 = scalar_lea.hbm %s1030_s12, 64 }
  0x37   : > { %p708_p0 = scmp.ne.s32.totalorder %s1030_s12, %s707_s28  ;;  %p709_p3 = pneg %p1036_p13 }
  0x38   : > { %s712_s10 = scalar_lea.hbm %s1217_s0, 128  ;;  %p713_p9 = scmp.lt.u32.totalorder %s1030_s12, %s1217_s0 }
  0x39   : > { %p710_p5 = pnand %p709_p3, %p708_p0  ;;  %p714_p1 = scmp.lt.u32.totalorder %s712_s10, %s707_s28 }
  0x3a   : > { %p716_p4 = scmp.lt.u32.totalorder %s707_s28, %s1030_s12 }
  0x3b   : > { %p711_p7 = pneg %p710_p5  ;;  %p715_p2 = por %p714_p1, %p713_p9 }
  0x3d   : > { %p717_p6 = por %p716_p4, %p715_p2 }
  0x3f   : > { %p718_p8 = pnand %p717_p6, %p711_p7 }
  0x41   : > { %721 = shalt.err (!%p718_p8)
}
  0x42   : > { %s722_s27 = scalar_lea.vmem %s1032_s14, 64  ;;  %s888_s13 = smov [#allocation2]  }
  0x43   : > { %p723_p12 = scmp.ne.s32.totalorder %s1032_s14, %s722_s27  ;;  %s727_s7 = sshll.u32 %s888_s13, 4  ;;  %s728_s7 = int_to_ptr.vmem [resolvable:$false] %s727_s7 }
  0x44   : > { %s729_s9 = scalar_lea.vmem %s728_s7, 128  ;;  %p730_p5 = scmp.lt.s32.totalorder %s1032_s14, %s728_s7 }
  0x45   : > { %p725_p11 = pnand %p723_p12, %p709_p3  ;;  %p731_p9 = scmp.lt.s32.totalorder %s729_s9, %s722_s27 }
  0x47   : > { %p726_p0 = pneg %p725_p11  ;;  %p732_p1 = por %p731_p9, %p730_p5 }
  0x49   : > { %p733_p2 = pnand %p732_p1, %p726_p0 }
  0x4b   : > { %736 = shalt.err (!%p733_p2)
}
  0x4c   : > { %607 = dma.hbm_to_vmem [thread:$0]  (!%p1036_p13), %s1030_s12, 64, %s1032_s14, %s202_s30  }
  0x4d   : > { %p1233_p7 = scmp.ne.s32.totalorder %s1227_s25, 0 }
  0x4e   : > { %s1068_s28 = sand.u32 (!%p1233_p7), 1, %s867_s16   ;;  %p1234_p3 = scmp.ne.s32.totalorder (!%p1233_p7), %s1225_s23, 0 }
  0x4f   : > { %222 = sbr.rel (%p1233_p7) target bundleno = 465 (0x1d1), region = 28  ;;  %s1071_s10 = sshll.u32 (!%p1233_p7), %s1068_s28, 2 }
  0x50   : > { %s225_s5 = scalar_lea.sflag (!%p1233_p7), [#allocation3], %s1068_s28  ;;  %s228_s11 = scalar_lea.vmem (!%p1233_p7), [#allocation2], %s1071_s10 }
  0x56   : > { %846 = dma.done.wait (%p1234_p3), %s225_s5, 64  }
  0x57   : > { %848 = vsyncadd (%p1234_p3), %s225_s5, 4294967232  ;;  %p1235_p13 = scmp.eq.s32.totalorder %s952_s21, 0 }
  0x59   : > { %850 = dma.done.wait (%p1235_p13), [#allocation6], 256   ;;  %p1236_p4 = pmov %p1235_p13 }
  0x5a   : > { %v889_v0 = vmov 0.0   ;;  %vm890_vm0 = vmmov 0   ;;  %v677_v1 = vld [vmem:[#allocation5] sm:$0xff]   ;;  %v678_v2 = vld [vmem:[#allocation5 + $0x8] sm:$0xff]   ;;  %v268_v3 = vld [vmem:[%s228_s11] sm:$0xf] }
  0x5b   : > { %852 = vsyncadd (%p1236_p4), [#allocation6], 4294967040  ;;  %580 = vmatprep.subr.bf16.mxu0 %v889_v0  ;;  %584 = vmatprep.mubr.msk.bf16.mxu0 %vm890_vm0, %v889_v0  ;;  %vm285_vm1 = vcmask 261120   ;;  %s1084_s23 = sshll.u32 %s875_s18, 6  ;;  %s252_s25 = scalar_lea.vmem [#allocation7], %s1071_s10  ;;  %vm331_vm2 = vcmask 257024  }
  0x5c   : > { %581 = vmatpush3.bf16.msra.mxu0 %v677_v1  ;;  %s370_s12 = sshll.u32 %s252_s25, 4  ;;  %s891_s14 = smov 96   ;;  %s1093_s12 = int_to_ptr.vmem [resolvable:$true] %s370_s12 }
  0x5d   : > { %582 = vmatprep.subr.bf16.mxu0 %v889_v0  ;;  %s1091_s27 = scalar_lea.hbm %s1219_s2, %s1084_s23  ;;  %s346_s18 = scalar_lea.sflag [#allocation4], %s1068_s28 }
  0x5e   : > { %s737_s13 = scalar_lea.vmem %s1093_s12, 64  ;;  %s892_s7 = smov [#allocation7]  }
  0x5f   : > { %p738_p6 = scmp.ne.s32.totalorder %s1093_s12, %s737_s13  ;;  %s741_s9 = sshll.u32 %s892_s7, 4  ;;  %s742_s9 = int_to_ptr.vmem [resolvable:$false] %s741_s9 }
  0x60   : > { %583 = vmatpush3.bf16.msra.mxu0 %v678_v2  ;;  %s743_s5 = scalar_lea.vmem %s742_s9, 128  ;;  %p744_p11 = scmp.lt.s32.totalorder %s1093_s12, %s742_s9 }
  0x61   : > { %p739_p8 = pnand %p738_p6, %p1015_p10  ;;  %p745_p0 = scmp.lt.s32.totalorder %s743_s5, %s737_s13 }
  0x63   : > { %585 = vmatmul.mubr.msk.bf16.vlgmr.msra.gmra.mrb[0].mxu0 %vm285_vm1, %v268_v3  ;;  %p740_p12 = pneg %p739_p8  ;;  %p746_p5 = por %p745_p0, %p744_p11 }
  0x65   : > { %p747_p9 = pnand %p746_p5, %p740_p12 }
 0x136   : > { %v323_v4 = vpop.f32.mrb[0].mxu0 }
 0x137   : > { %v329_v5 = vmul.f32 0.17677669, %v323_v4  ;;  %v586_v6 = vpop.f32.mrb[1].mxu0  ;;  %v576_v7 = vpack.c.bf16 %v323_v4, %v323_v4 }
 0x138   : > { %v326_v8 = vpop.f32.mrb[2].mxu0 }
 0x139   : > { %v330_v9 = vpack.c.bf16 %v329_v5, %v329_v5  ;;  %337 = vrot.lane.b32.xlu0 %v576_v7, %s891_s14  ;;  %v587_v10 = vpop.f32.mrb[3].mxu0 }
 0x13b   : > { %332 = vst.msk [vmem:[%s252_s25] sm:$0xf] %vm331_vm2, %v330_v9 }
 0x13c   : > { %750 = shalt.err (!%p747_p9)
}
 0x13d   : > { %s751_s28 = scalar_lea.hbm %s1091_s27, 64  ;;  %s755_s14 = scalar_lea.hbm %s1219_s2, 128 }
 0x13e   : > { %p752_p1 = scmp.ne.s32.totalorder %s1091_s27, %s751_s28  ;;  %p756_p3 = scmp.lt.u32.totalorder %s1091_s27, %s1219_s2 }
 0x13f   : > { %p757_p13 = scmp.lt.u32.totalorder %s755_s14, %s751_s28  ;;  %p759_p6 = scmp.lt.u32.totalorder %s751_s28, %s1091_s27 }
 0x140   : > { %p753_p2 = pnand %p752_p1, %p1015_p10 }
 0x141   : > { %p758_p4 = por %p757_p13, %p756_p3 }
 0x142   : > { %p754_p7 = pneg %p753_p2 }
 0x143   : > { %p760_p8 = por %p759_p6, %p758_p4 }
 0x145   : > { %p761_p12 = pnand %p760_p8, %p754_p7 }
 0x147   : > { %764 = shalt.err (!%p761_p12)
}
 0x148   : > { %594 = dma.vmem_to_hbm [thread:$0]  (%p1015_p10), %s1093_s12, 64, %s1091_s27, %s346_s18  }
 0x149   : > { %s893_s13 = smov 64   ;;  %s350_s7 = sand.u32 1, %s952_s21  }
 0x14a   : > { %341 = vrot.lane.b32.xlu0 %v576_v7, %s893_s13  ;;  %s259_s9 = scalar_lea.vmem [#allocation8], %s1071_s10  ;;  %s1124_s25 = scalar_lea.hbm %s1220_s3, %s1084_s23 }
 0x14b   : > { %s384_s5 = sshll.u32 %s259_s9, 4  ;;  %s266_s14 = scalar_lea.vmem [#allocation10], %s1071_s10  ;;  %s1126_s5 = int_to_ptr.vmem [resolvable:$true] %s384_s5 }
 0x14c   : > { %s1131_s26 = sshll.u32 %s266_s14, 4  ;;  %s1134_s21 = scalar_lea.sflag [#allocation9], %s350_s7  ;;  %s1165_s26 = int_to_ptr.vmem [resolvable:$true] %s1131_s26 }
 0x14d   : > { %s765_s12 = scalar_lea.vmem %s1126_s5, 64  ;;  %s894_s27 = smov [#allocation8]  }
 0x14e   : > { %p766_p11 = scmp.ne.s32.totalorder %s1126_s5, %s765_s12  ;;  %s769_s18 = sshll.u32 %s894_s27, 4  ;;  %s770_s18 = int_to_ptr.vmem [resolvable:$false] %s769_s18 }
 0x14f   : > { %s771_s30 = scalar_lea.vmem %s770_s18, 128  ;;  %p772_p9 = scmp.lt.s32.totalorder %s1126_s5, %s770_s18 }
 0x150   : > { %p767_p0 = pnand %p766_p11, %p1015_p10  ;;  %p773_p1 = scmp.lt.s32.totalorder %s771_s30, %s765_s12 }
 0x152   : > { %p768_p5 = pneg %p767_p0  ;;  %p774_p2 = por %p773_p1, %p772_p9 }
 0x154   : > { %p775_p7 = pnand %p774_p2, %p768_p5 }
 0x1ab   : > { %v338_v11 = vpop.permute.xlu0 %337 }
 0x1ac   : > { %340 = vst.msk [vmem:[%s259_s9] sm:$0xf] %vm331_vm2, %v338_v11 }
 0x1ad   : > { %778 = shalt.err (!%p775_p7)
}
 0x1ae   : > { %s779_s13 = scalar_lea.hbm %s1124_s25, 64  ;;  %s783_s28 = scalar_lea.hbm %s1220_s3, 128 }
 0x1af   : > { %p780_p3 = scmp.ne.s32.totalorder %s1124_s25, %s779_s13  ;;  %p784_p6 = scmp.lt.u32.totalorder %s1124_s25, %s1220_s3 }
 0x1b0   : > { %p785_p8 = scmp.lt.u32.totalorder %s783_s28, %s779_s13  ;;  %p787_p11 = scmp.lt.u32.totalorder %s779_s13, %s1124_s25 }
 0x1b1   : > { %p781_p13 = pnand %p780_p3, %p1015_p10 }
 0x1b2   : > { %p786_p12 = por %p785_p8, %p784_p6 }
 0x1b3   : > { %p782_p4 = pneg %p781_p13 }
 0x1b4   : > { %p788_p0 = por %p787_p11, %p786_p12 }
 0x1b6   : > { %p789_p5 = pnand %p788_p0, %p782_p4 }
 0x1b8   : > { %792 = shalt.err (!%p789_p5)
}
 0x1b9   : > { %595 = dma.vmem_to_hbm [thread:$0]  (%p1015_p10), %s1126_s5, 64, %s1124_s25, %s1134_s21  }
 0x1ba   : > { %s1162_s30 = scalar_lea.hbm %s1221_s4, %s1084_s23  ;;  %s793_s13 = scalar_lea.vmem %s1165_s26, 64 }
 0x1bb   : > { %p794_p9 = scmp.ne.s32.totalorder %s1165_s26, %s793_s13  ;;  %s895_s5 = smov [#allocation10]  }
 0x1bc   : > { %v342_v12 = vpop.permute.xlu0 %341  ;;  %s797_s25 = sshll.u32 %s895_s5, 4  ;;  %s798_s25 = int_to_ptr.vmem [resolvable:$false] %s797_s25 }
 0x1bd   : > { %344 = vst.msk [vmem:[%s266_s14] sm:$0xf] %vm331_vm2, %v342_v12  ;;  %p795_p1 = pnand %p794_p9, %p1015_p10  ;;  %s799_s7 = scalar_lea.vmem %s798_s25, 128 }
 0x1be   : > { %p800_p7 = scmp.lt.s32.totalorder %s1165_s26, %s798_s25  ;;  %p801_p3 = scmp.lt.s32.totalorder %s799_s7, %s793_s13 }
 0x1bf   : > { %p796_p2 = pneg %p795_p1 }
 0x1c0   : > { %p802_p13 = por %p801_p3, %p800_p7 }
 0x1c2   : > { %p803_p4 = pnand %p802_p13, %p796_p2 }
 0x1c4   : > { %806 = shalt.err (!%p803_p4)
}
 0x1c5   : > { %s807_s10 = scalar_lea.hbm %s1162_s30, 64  ;;  %s811_s9 = scalar_lea.hbm %s1221_s4, 128 }
 0x1c6   : > { %p808_p6 = scmp.ne.s32.totalorder %s1162_s30, %s807_s10  ;;  %p812_p11 = scmp.lt.u32.totalorder %s1162_s30, %s1221_s4 }
 0x1c7   : > { %p813_p0 = scmp.lt.u32.totalorder %s811_s9, %s807_s10  ;;  %p815_p9 = scmp.lt.u32.totalorder %s807_s10, %s1162_s30 }
 0x1c8   : > { %p809_p8 = pnand %p808_p6, %p1015_p10 }
 0x1c9   : > { %p814_p5 = por %p813_p0, %p812_p11 }
 0x1ca   : > { %p810_p12 = pneg %p809_p8 }
 0x1cb   : > { %p816_p1 = por %p815_p9, %p814_p5 }
 0x1cd   : > { %p817_p2 = pnand %p816_p1, %p810_p12 }
 0x1cf   : > { %820 = shalt.err (!%p817_p2)
}
 0x1d0   : > { %596 = dma.vmem_to_hbm [thread:$0]  (%p1015_p10), %s1165_s26, 64, %s1162_s30, %s1134_s21  }
 0x1d1 PF: > { %s410_s27 = sand.u32 1, %s863_s15   ;;  %p1237_p7 = scmp.ne.s32.totalorder %s1226_s24, 0 }
 0x1d2   : > { %p1238_p3 = scmp.ge.s32.totalorder %s883_s20, 2  ;;  %s411_s12 = scalar_lea.sflag [#allocation4], %s410_s27 }
 0x1d4   : > { %p609_p13 = pnand %p1238_p3, %p1237_p7 }
 0x1d6   : > { %854 = dma.done.wait (!%p609_p13), %s411_s12, 64  }
 0x1d7   : > { %856 = vsyncadd (!%p609_p13), %s411_s12, 4294967232  ;;  %s419_s18 = sand.u32 1, %s552_s22  }
 0x1d8   : > { %s420_s13 = scalar_lea.sflag [#allocation9], %s419_s18 }
 0x1d9   : > { %858 = dma.done.wait (!%p609_p13), %s420_s13, 128  }
 0x1da   : > { %860 = vsyncadd (!%p609_p13), %s420_s13, 4294967168  ;;  %s25_s20 = sadd.s32 1, %s883_s20   ;;  %s1239_s15 = smov %s867_s16 }
 0x1db   : > { %p22_p10 = scmp.ge.s32.totalorder %s25_s20, 4   ;;  %s1240_s16 = smov %s871_s17 }
 0x1dc   : > { %s1241_s17 = smov %s1024_s8  ;;  %s1242_s18 = smov %s879_s19 }
 0x1dd   : > { %s1243_s19 = smov %s1245_s29  ;;  %24 = sbr.rel (!%p22_p10) target bundleno = 9 (0x9), region = 109 }
 0x1e4   :  { %434 = vsyncpa [#allocation3], 1 }
 0x1e5   :  { %436 = vsyncpa [#allocation3 + $0x1], 1 }
 0x1e6   :  { %437 = vsyncpa [#allocation6], 1 }
 0x1e7   :  { %438 = vsyncpa [#allocation4], 1 }
 0x1e8   :  { %440 = vsyncpa [#allocation4 + $0x1], 1 }
 0x1e9   :  { %441 = vsyncpa [#allocation9], 1 }
 0x1ea   :  { %443 = vsyncpa [#allocation9 + $0x1], 1 }

</bundles_post_ra>
